<compile_context>
chip_gen: v5e
topology: v5e:2x2
jax: 0.10.0
libtpu: 0.0.40
codegen_flags: <defaults>
</compile_context>

<pallas_src>
import functools
import math

import jax
import jax.numpy as jnp
from jax import lax
from jax.experimental import pallas as pl
from jax.experimental.pallas import tpu as pltpu


# -----------------------------------------------------------------------------
# Kernel
# -----------------------------------------------------------------------------
def _fft2_real_kernel(x_ref, cw_ref, sw_ref, ch_ref, sh_ref, o_ref,
                      yc_ref, ys_ref):
    """One grid step: TB planes of  Re(fft2(X)) = C_H @ X @ C_W - S_H @ X @ S_W."""
    tb, h, w = x_ref.shape
    cd = cw_ref.dtype                      # MXU operand dtype (bf16 or f32)

    # ---- Right-side DFT: one flat, weight-stationary matmul per cos/sin ----
    # (TB*H, W) @ (W, W) with f32 accumulation.  The wrapper guarantees
    # H % 8 == 0, so these reshapes are pure sublane relabels (no VMEM copy).
    xf = x_ref[...].reshape(tb * h, w)
    yc = jnp.dot(xf, cw_ref[...], preferred_element_type=jnp.float32)
    ys = jnp.dot(xf, sw_ref[...], preferred_element_type=jnp.float32)
    yc_ref[...] = yc.astype(cd).reshape(tb, h, w)
    ys_ref[...] = ys.astype(cd).reshape(tb, h, w)

    # ---- Left-side DFT: per-plane 2-D matmuls sharing the (H, H) weights ----
    # No (TB, H, 2H) broadcast and no concatenate/relayout of the intermediate:
    # cos and sin paths are combined with a single VPU subtract per plane.
    ch = ch_ref[...]
    sh = sh_ref[...]

    def body(b, carry):
        out_b = (jnp.dot(ch, yc_ref[b], preferred_element_type=jnp.float32)
                 - jnp.dot(sh, ys_ref[b], preferred_element_type=jnp.float32))
        o_ref[b] = out_b.astype(o_ref.dtype)
        return carry

    lax.fori_loop(0, tb, body, 0, unroll=tb <= 8)


# -----------------------------------------------------------------------------
# Host-side helpers
# -----------------------------------------------------------------------------
def _dft_cos_sin(n: int, n_pad: int, dtype):
    """Zero-padded (n_pad, n_pad) DFT cosine/sine matrices for a length-n DFT."""
    if n > 46340:
        raise ValueError("int32 j*k overflows for DFT length > 46340")
    j = jnp.arange(n, dtype=jnp.int32)
    jk_mod = (j[:, None] * j[None, :]) % n            # exact phase index mod n
    phase = jk_mod.astype(jnp.float32) * jnp.float32(2.0 * math.pi / n)
    cos, sin = jnp.cos(phase), jnp.sin(phase)
    if n_pad != n:
        pad = ((0, n_pad - n), (0, n_pad - n))
        cos, sin = jnp.pad(cos, pad), jnp.pad(sin, pad)
    return cos.astype(dtype), sin.astype(dtype)


def _hw_budget():
    """Return (vmem_limit_bytes, per-step input-bytes target, is_small_vmem)."""
    try:
        cap = int(pltpu.get_tpu_info().vmem_capacity_bytes)
    except Exception:
        cap = 64 << 20                      # conservative: assume v7x-sized VMEM
    if cap < (100 << 20):                   # v7x-class: 64 MiB per TensorCore
        return 32 << 20, 2 << 20, True
    return 96 << 20, 6 << 20, False         # v5e / v6e: 128 MiB per TensorCore


def _choose_plane_batch(nc, hp, w, cd_size, vmem_limit, in_target, small_vmem):
    plane_in = hp * w * cd_size
    plane_out = hp * w * 4

    def vmem_est(t):
        blocks = t * 2 * (plane_in + plane_out)        # double-buffered x / out
        scratch = t * 2 * plane_in                     # yc / ys scratch refs
        temps = t * 2 * plane_out                      # f32 matmul results
        consts = (2 * hp * hp + 2 * w * w) * cd_size   # single-buffered DFT mats
        return blocks + scratch + temps + consts

    budget = int(vmem_limit * 0.7)
    tb = max(1, min(256, in_target // max(plane_in, 1)))
    tb = min(tb, nc)
    if small_vmem and nc >= 4:
        tb = min(tb, pl.cdiv(nc, 4))        # >= 4 evenly loaded steps on v7x
    while tb > 1 and vmem_est(tb) > budget:
        tb = max(1, tb // 2)
    # Prefer a plane batch that divides NC so no HBM zero-pad copy is needed.
    d = tb
    while d > 1 and nc % d != 0:
        d -= 1
    if d >= max(1, tb // 2):
        tb = d
    return max(1, tb)


@functools.partial(
    jax.jit, static_argnames=("tb", "h_pad", "compute_dtype", "vmem_limit"))
def _fft2_real(x, *, tb, h_pad, compute_dtype, vmem_limit):
    n, c, h, w = x.shape
    nc = n * c
    cd = jnp.dtype(compute_dtype)

    steps = pl.cdiv(nc, tb)
    nc_pad = steps * tb

    # Cast to the MXU compute dtype in the wrapper (halves HBM->VMEM DMA when
    # bf16); pad the plane count / H only if actually needed.
    xp = x.reshape(nc, h, w).astype(cd)
    if nc_pad != nc or h_pad != h:
        xp = jnp.pad(xp, ((0, nc_pad - nc), (0, h_pad - h), (0, 0)))

    cw, sw = _dft_cos_sin(w, w, cd)          # (W, W)
    ch, sh = _dft_cos_sin(h, h_pad, cd)      # (Hp, Hp), zero-padded rows/cols

    plane_spec = pl.BlockSpec((tb, h_pad, w), lambda b: (b, 0, 0))
    const_w = pl.BlockSpec((w, w), lambda b: (0, 0),
                           pipeline_mode=pl.Buffered(1))
    const_h = pl.BlockSpec((h_pad, h_pad), lambda b: (0, 0),
                           pipeline_mode=pl.Buffered(1))

    flops = 4 * nc_pad * h_pad * w * (h_pad + w)
    bytes_accessed = (nc_pad * h_pad * w * (cd.itemsize + 4)
                      + (2 * h_pad * h_pad + 2 * w * w) * cd.itemsize)

    out = pl.pallas_call(
        _fft2_real_kernel,
        out_shape=jax.ShapeDtypeStruct((nc_pad, h_pad, w), jnp.float32),
        grid_spec=pltpu.PrefetchScalarGridSpec(
            num_scalar_prefetch=0,
            grid=(steps,),
            in_specs=[plane_spec, const_w, const_w, const_h, const_h],
            out_specs=plane_spec,
            scratch_shapes=[pltpu.VMEM((tb, h_pad, w), cd),
                            pltpu.VMEM((tb, h_pad, w), cd)]),
        compiler_params=pltpu.CompilerParams(
            dimension_semantics=("parallel",),
            vmem_limit_bytes=vmem_limit),
        cost_estimate=pl.CostEstimate(
            flops=int(flops), transcendentals=0,
            bytes_accessed=int(bytes_accessed)),
    )(xp, cw, sw, ch, sh)

    out = out[:nc, :h, :]
    return out.reshape(n, c, h, w)


def identity_fft_conv2d(x, *, compute_dtype=jnp.bfloat16, plane_batch=None):
    """Real part of fft2 over the last two dims of a real (N, C, H, W) array."""
    if x.ndim != 4:
        raise ValueError(f"expected (N, C, H, W), got {x.shape}")
    n, c, h, w = x.shape
    nc = n * c
    cd = jnp.dtype(compute_dtype)
    h_pad = -(-h // 8) * 8                   # keep in-kernel reshapes relabels

    vmem_limit, in_target, small_vmem = _hw_budget()
    tb = plane_batch if plane_batch is not None else _choose_plane_batch(
        nc, h_pad, w, cd.itemsize, vmem_limit, in_target, small_vmem)
    tb = max(1, min(int(tb), nc))

    # TODO(synk): for W < 128 with H >= 128 a transposed-flattened left product
    # would give a lane-dense (>=128-lane) output store; not implemented here.
    return _fft2_real(x, tb=tb, h_pad=h_pad, compute_dtype=cd,
                      vmem_limit=vmem_limit)


if __name__ == "__main__":
    key = jax.random.PRNGKey(0)
    x = jax.random.normal(key, (2, 4, 16, 16), dtype=jnp.float32)

    ref = jnp.real(jnp.fft.fft2(x, axes=(-2, -1)))

    # Default path: bf16 MXU operands with f32 accumulation.
    out = identity_fft_conv2d(x)
    jax.block_until_ready(out)
    assert out.shape == ref.shape and out.dtype == jnp.float32
    assert jnp.allclose(out, ref, atol=3e-1, rtol=3e-2), "bf16 path mismatch"

    # f32 escape hatch for tight tolerances.
    out_f32 = identity_fft_conv2d(x, compute_dtype=jnp.float32)
    jax.block_until_ready(out_f32)
    assert jnp.allclose(out_f32, ref, atol=2e-3, rtol=2e-3), "f32 path mismatch"

    print("KERNEL_OK")
</pallas_src>

<mosaic_0001>
module attributes {stable_mosaic.version = 11 : i64} {
  func.func @_fft2_real_kernel(%arg0: i32, %arg1: memref<2x16x16xbf16, #tpu.memory_space<vmem>>, %arg2: memref<16x16xbf16, #tpu.memory_space<vmem>>, %arg3: memref<16x16xbf16, #tpu.memory_space<vmem>>, %arg4: memref<16x16xbf16, #tpu.memory_space<vmem>>, %arg5: memref<16x16xbf16, #tpu.memory_space<vmem>>, %arg6: memref<2x16x16xf32, #tpu.memory_space<vmem>>, %arg7: memref<2x16x16xbf16, #tpu.memory_space<vmem>>, %arg8: memref<2x16x16xbf16, #tpu.memory_space<vmem>>) attributes {dimension_semantics = [#tpu.dimension_semantics<parallel>], iteration_bounds = array<i64: 4>, scalar_prefetch = 0 : i64, scratch_operands = 2 : i64, tpu.core_type = #tpu.core_type<tc>, window_params = [{transform_indices = @transform_0, window_bounds = array<i64: 2, 16, 16>}, {pipeline_mode = #tpu.pipeline_mode<synchronous>, transform_indices = @transform_1, window_bounds = array<i64: 16, 16>}, {pipeline_mode = #tpu.pipeline_mode<synchronous>, transform_indices = @transform_2, window_bounds = array<i64: 16, 16>}, {pipeline_mode = #tpu.pipeline_mode<synchronous>, transform_indices = @transform_3, window_bounds = array<i64: 16, 16>}, {pipeline_mode = #tpu.pipeline_mode<synchronous>, transform_indices = @transform_4, window_bounds = array<i64: 16, 16>}, {transform_indices = @transform_5, window_bounds = array<i64: 2, 16, 16>}]} {
    %c0 = arith.constant 0 : index
    %c0_0 = arith.constant 0 : index
    %c0_1 = arith.constant 0 : index
    %0 = vector.load %arg1[%c0, %c0_0, %c0_1] : memref<2x16x16xbf16, #tpu.memory_space<vmem>>, vector<2x16x16xbf16>
    %1 = vector.shape_cast %0 : vector<2x16x16xbf16> to vector<32x16xbf16>
    %c0_2 = arith.constant 0 : index
    %c0_3 = arith.constant 0 : index
    %2 = vector.load %arg2[%c0_2, %c0_3] : memref<16x16xbf16, #tpu.memory_space<vmem>>, vector<16x16xbf16>
    %cst = arith.constant dense<0.000000e+00> : vector<32x16xf32>
    %3 = tpu.matmul %1, %2, %cst {dimension_numbers = #tpu.dot_dimension_numbers<[1], [0], [0], [1], [0, 0, 1, 1], [], []>} : vector<32x16xbf16>, vector<16x16xbf16>, vector<32x16xf32> -> vector<32x16xf32>
    %c0_4 = arith.constant 0 : index
    %c0_5 = arith.constant 0 : index
    %4 = vector.load %arg3[%c0_4, %c0_5] : memref<16x16xbf16, #tpu.memory_space<vmem>>, vector<16x16xbf16>
    %cst_6 = arith.constant dense<0.000000e+00> : vector<32x16xf32>
    %5 = tpu.matmul %1, %4, %cst_6 {dimension_numbers = #tpu.dot_dimension_numbers<[1], [0], [0], [1], [0, 0, 1, 1], [], []>} : vector<32x16xbf16>, vector<16x16xbf16>, vector<32x16xf32> -> vector<32x16xf32>
    %6 = arith.truncf %3 : vector<32x16xf32> to vector<32x16xbf16>
    %7 = vector.shape_cast %6 : vector<32x16xbf16> to vector<2x16x16xbf16>
    %c0_7 = arith.constant 0 : index
    %c0_8 = arith.constant 0 : index
    %c0_9 = arith.constant 0 : index
    %8 = vector.load %arg7[%c0_7, %c0_8, %c0_9] : memref<2x16x16xbf16, #tpu.memory_space<vmem>>, vector<2x16x16xbf16>
    tpu.vector_store %arg7[%c0_7, %c0_8, %c0_9], %7 {strides = array<i32>} : memref<2x16x16xbf16, #tpu.memory_space<vmem>>, vector<2x16x16xbf16>,
    %9 = arith.truncf %5 : vector<32x16xf32> to vector<32x16xbf16>
    %10 = vector.shape_cast %9 : vector<32x16xbf16> to vector<2x16x16xbf16>
    %c0_10 = arith.constant 0 : index
    %c0_11 = arith.constant 0 : index
    %c0_12 = arith.constant 0 : index
    %11 = vector.load %arg8[%c0_10, %c0_11, %c0_12] : memref<2x16x16xbf16, #tpu.memory_space<vmem>>, vector<2x16x16xbf16>
    tpu.vector_store %arg8[%c0_10, %c0_11, %c0_12], %10 {strides = array<i32>} : memref<2x16x16xbf16, #tpu.memory_space<vmem>>, vector<2x16x16xbf16>,
    %c0_13 = arith.constant 0 : index
    %c0_14 = arith.constant 0 : index
    %12 = vector.load %arg4[%c0_13, %c0_14] : memref<16x16xbf16, #tpu.memory_space<vmem>>, vector<16x16xbf16>
    %c0_15 = arith.constant 0 : index
    %c0_16 = arith.constant 0 : index
    %13 = vector.load %arg5[%c0_15, %c0_16] : memref<16x16xbf16, #tpu.memory_space<vmem>>, vector<16x16xbf16>
    %c0_i32 = arith.constant 0 : i32
    %14 = arith.index_cast %c0_i32 : i32 to index
    %c0_17 = arith.constant 0 : index
    %c0_18 = arith.constant 0 : index
    %15 = vector.load %arg7[%14, %c0_17, %c0_18] : memref<2x16x16xbf16, #tpu.memory_space<vmem>>, vector<1x16x16xbf16>
    %16 = vector.shape_cast %15 : vector<1x16x16xbf16> to vector<16x16xbf16>
    %cst_19 = arith.constant dense<0.000000e+00> : vector<16x16xf32>
    %17 = tpu.matmul %12, %16, %cst_19 {dimension_numbers = #tpu.dot_dimension_numbers<[1], [0], [0], [1], [0, 0, 1, 1], [], []>} : vector<16x16xbf16>, vector<16x16xbf16>, vector<16x16xf32> -> vector<16x16xf32>
    %18 = arith.index_cast %c0_i32 : i32 to index
    %c0_20 = arith.constant 0 : index
    %c0_21 = arith.constant 0 : index
    %19 = vector.load %arg8[%18, %c0_20, %c0_21] : memref<2x16x16xbf16, #tpu.memory_space<vmem>>, vector<1x16x16xbf16>
    %20 = vector.shape_cast %19 : vector<1x16x16xbf16> to vector<16x16xbf16>
    %cst_22 = arith.constant dense<0.000000e+00> : vector<16x16xf32>
    %21 = tpu.matmul %13, %20, %cst_22 {dimension_numbers = #tpu.dot_dimension_numbers<[1], [0], [0], [1], [0, 0, 1, 1], [], []>} : vector<16x16xbf16>, vector<16x16xbf16>, vector<16x16xf32> -> vector<16x16xf32>
    %22 = arith.subf %17, %21 : vector<16x16xf32>
    %23 = arith.index_cast %c0_i32 : i32 to index
    %c0_23 = arith.constant 0 : index
    %c0_24 = arith.constant 0 : index
    %24 = vector.load %arg6[%23, %c0_23, %c0_24] : memref<2x16x16xf32, #tpu.memory_space<vmem>>, vector<1x16x16xf32>
    %25 = vector.shape_cast %24 : vector<1x16x16xf32> to vector<16x16xf32>
    %26 = vector.shape_cast %22 : vector<16x16xf32> to vector<1x16x16xf32>
    tpu.vector_store %arg6[%23, %c0_23, %c0_24], %26 {strides = array<i32>} : memref<2x16x16xf32, #tpu.memory_space<vmem>>, vector<1x16x16xf32>,
    %c1_i32 = arith.constant 1 : i32
    %27 = arith.index_cast %c1_i32 : i32 to index
    %c0_25 = arith.constant 0 : index
    %c0_26 = arith.constant 0 : index
    %28 = vector.load %arg7[%27, %c0_25, %c0_26] : memref<2x16x16xbf16, #tpu.memory_space<vmem>>, vector<1x16x16xbf16>
    %29 = vector.shape_cast %28 : vector<1x16x16xbf16> to vector<16x16xbf16>
    %cst_27 = arith.constant dense<0.000000e+00> : vector<16x16xf32>
    %30 = tpu.matmul %12, %29, %cst_27 {dimension_numbers = #tpu.dot_dimension_numbers<[1], [0], [0], [1], [0, 0, 1, 1], [], []>} : vector<16x16xbf16>, vector<16x16xbf16>, vector<16x16xf32> -> vector<16x16xf32>
    %31 = arith.index_cast %c1_i32 : i32 to index
    %c0_28 = arith.constant 0 : index
    %c0_29 = arith.constant 0 : index
    %32 = vector.load %arg8[%31, %c0_28, %c0_29] : memref<2x16x16xbf16, #tpu.memory_space<vmem>>, vector<1x16x16xbf16>
    %33 = vector.shape_cast %32 : vector<1x16x16xbf16> to vector<16x16xbf16>
    %cst_30 = arith.constant dense<0.000000e+00> : vector<16x16xf32>
    %34 = tpu.matmul %13, %33, %cst_30 {dimension_numbers = #tpu.dot_dimension_numbers<[1], [0], [0], [1], [0, 0, 1, 1], [], []>} : vector<16x16xbf16>, vector<16x16xbf16>, vector<16x16xf32> -> vector<16x16xf32>
    %35 = arith.subf %30, %34 : vector<16x16xf32>
    %36 = arith.index_cast %c1_i32 : i32 to index
    %c0_31 = arith.constant 0 : index
    %c0_32 = arith.constant 0 : index
    %37 = vector.load %arg6[%36, %c0_31, %c0_32] : memref<2x16x16xf32, #tpu.memory_space<vmem>>, vector<1x16x16xf32>
    %38 = vector.shape_cast %37 : vector<1x16x16xf32> to vector<16x16xf32>
    %39 = vector.shape_cast %35 : vector<16x16xf32> to vector<1x16x16xf32>
    tpu.vector_store %arg6[%36, %c0_31, %c0_32], %39 {strides = array<i32>} : memref<2x16x16xf32, #tpu.memory_space<vmem>>, vector<1x16x16xf32>,
    %c2_i32 = arith.constant 2 : i32
    return
  }
  func.func @transform_0(%arg0: i32) -> (i32, i32, i32) {
    %c0_i32 = arith.constant 0 : i32
    %c0_i32_0 = arith.constant 0 : i32
    %c0_i32_1 = arith.constant 0 : i32
    return %arg0, %c0_i32, %c0_i32_0 : i32, i32, i32
  }
  func.func @transform_1(%arg0: i32) -> (i32, i32) {
    %c0_i32 = arith.constant 0 : i32
    %c0_i32_0 = arith.constant 0 : i32
    %c0_i32_1 = arith.constant 0 : i32
    return %c0_i32, %c0_i32_0 : i32, i32
  }
  func.func @transform_2(%arg0: i32) -> (i32, i32) {
    %c0_i32 = arith.constant 0 : i32
    %c0_i32_0 = arith.constant 0 : i32
    %c0_i32_1 = arith.constant 0 : i32
    return %c0_i32, %c0_i32_0 : i32, i32
  }
  func.func @transform_3(%arg0: i32) -> (i32, i32) {
    %c0_i32 = arith.constant 0 : i32
    %c0_i32_0 = arith.constant 0 : i32
    %c0_i32_1 = arith.constant 0 : i32
    return %c0_i32, %c0_i32_0 : i32, i32
  }
  func.func @transform_4(%arg0: i32) -> (i32, i32) {
    %c0_i32 = arith.constant 0 : i32
    %c0_i32_0 = arith.constant 0 : i32
    %c0_i32_1 = arith.constant 0 : i32
    return %c0_i32, %c0_i32_0 : i32, i32
  }
  func.func @transform_5(%arg0: i32) -> (i32, i32, i32) {
    %c0_i32 = arith.constant 0 : i32
    %c0_i32_0 = arith.constant 0 : i32
    %c0_i32_1 = arith.constant 0 : i32
    return %arg0, %c0_i32, %c0_i32_0 : i32, i32, i32
  }
}

</mosaic_0001>

<bundles_post_ra>
// kernel: _fft2_real.1
= control target key start
LH: loop header
LB: loop body
LE: loop exit
PB: predicated region body
PF: predicated region fallthrough
CT: control target
= control target key end

     0   :  { %10 = vsyncpa [#allocation5], 0  ;;  %s850_s0 = inlined_call_operand.vmem [shape: bf16[8,16,16], index: 0, kind: input, shape index: {}]   ;;  %s851_s1 = inlined_call_operand.vmem [shape: bf16[16,16], index: 1, kind: input, shape index: {}, may-alias: {1,3}]   ;;  %s852_s2 = inlined_call_operand.vmem [shape: bf16[16,16], index: 2, kind: input, shape index: {}, may-alias: {2,4}]   ;;  %s853_s3 = inlined_call_operand.vmem [shape: bf16[16,16], index: 3, kind: input, shape index: {}, may-alias: {1,3}]   ;;  %s854_s4 = inlined_call_operand.vmem [shape: bf16[16,16], index: 4, kind: input, shape index: {}, may-alias: {2,4}]   ;;  %s855_s5 = inlined_call_operand.hbm [shape: f32[8,16,16], index: 5, kind: output, shape index: {}]  }
   0x1   :  { %12 = vsyncpa [#allocation5 + $0x1], 0  ;;  %s734_s18 = smov 0   ;;  %s736_s19 = smov 0  }
   0x2   :  { %s738_s20 = smov 0   ;;  %s740_s21 = smov 0  }
   0x3 LB: > { %s755_s22 = sadd.s32 4294967295, %s700_s21   ;;  %s520_s23 = sadd.s32 4294967294, %s700_s21   ;;  %s700_s21 = sphi %s740_s21, %s861_s21   ;;  %s696_s20 = sphi %s738_s20, %s860_s20   ;;  %s692_s19 = sphi %s736_s19, %s859_s19   ;;  %s688_s18 = sphi %s734_s18, %s858_s18  }
   0x4   : > { %s759_s24 = sadd.s32 1, %s700_s21   ;;  %s135_s25 = sadd.s32 1, %s696_s20 }
   0x5   : > { %s132_s26 = ssub.s32 %s700_s21, %s759_s24  ;;  %p145_p0 = scmp.ne.s32.totalorder %s696_s20, %s692_s19 }
   0x6   : > { %p133_p1 = scmp.eq.s32.totalorder %s132_s26, 0  ;;  %p146_p2 = scmp.eq.s32.totalorder %s755_s22, 3 }
   0x7   : > { %p151_p3 = scmp.ne.s32.totalorder %s692_s19, %s688_s18  ;;  %p152_p4 = scmp.eq.s32.totalorder %s520_s23, 3 }
   0x8   : > { %s770_s27 = scalar_select %p133_p1, %s696_s20, %s135_s25  }
   0x9   : > { %p772_p5 = por %p146_p2, %p145_p0  ;;  %p776_p6 = por %p152_p4, %p151_p3 }
   0xa   : > { %p523_p7 = scmp.ge.s32.totalorder %s700_s21, 1  ;;  %p192_p8 = scmp.lt.s32.totalorder %s700_s21, 5 }
   0xc   : > { %p193_p9 = pnand %p523_p7, %p192_p8 }
   0xd   : > { %s525_s9 = sshll.u32 (!%p193_p9), %s755_s22, 1  ;;  %s218_s23 = sand.u32 (!%p193_p9), 1, %s692_s19  }
   0xe   : > { %196 = sbr.rel (%p193_p9) target bundleno = 333 (0x14d), region = 40  ;;  %p222_p10 = scmp.lt.s32.totalorder (!%p193_p9), %s525_s9, 7 }
   0xf   : > { %s524_s25 = sshll.u32 (!%p193_p9), %s218_s23, 5  ;;  %s596_s30 = sshll.u32 (!%p193_p9), %s755_s22, 5 }
  0x10   : > { %s220_s26 = scalar_lea.vmem (!%p193_p9), [#allocation4], %s524_s25  ;;  %s454_s8 = scalar_lea.hbm (!%p193_p9), %s855_s5, %s596_s30 }
  0x11   : > { %s442_s11 = scalar_lea.sflag (!%p193_p9), [#allocation5], %s218_s23  ;;  %s658_s15 = scalar_lea.hbm (!%p193_p9), %s855_s5, 128 }
  0x13   : > { %v587_v0 = vld [vmem:[%s851_s1] sm:$0xff]  ;;  %s863_s9 = smov (!%p222_p10, %s525_s9), 7  ;;  %vm252_vm0 = vcmask 130048   ;;  %vm309_vm1 = vcmask 125952  }
  0x14   : > { %v588_v1 = vld [vmem:[%s852_s2] sm:$0xff]  ;;  %266 = vmatpush.bf16.msra.mxu0 %v587_v0  ;;  %s584_s10 = sshll.u32 %s863_s9, 3  ;;  %s455_s9 = sshll.u32 %s220_s26, 4  ;;  %s456_s9 = int_to_ptr.vmem [resolvable:$true] %s455_s9 }
  0x15   : > { %293 = vmatpush.bf16.msra.mxu1 %v588_v1  ;;  %s226_s13 = scalar_lea.vmem %s850_s0, %s584_s10  ;;  %v589_v18 = vld [vmem:[%s853_s3] sm:$0xff]  ;;  %s457_s10 = sshll.u32 %s454_s8, 4  ;;  %s458_s10 = int_to_ptr.hbm [resolvable:$true] %s457_s10 }
  0x16   : > { %v585_v2 = vld [vmem:[%s226_s13] sm:$0xff]  ;;  %v586_v3 = vld [vmem:[%s226_s13 + $0x8] sm:$0xff]  ;;  %s652_s22 = sshra.s32 %s458_s10, 4  ;;  %s653_s22 = int_to_ptr.hbm [resolvable:$true] %s652_s22 }
  0x17   : > { %540 = vmatmul.msk.bf16.vlgmr.msra.gmra.mxu0 %vm252_vm0, %v585_v2  ;;  %v590_v19 = vld [vmem:[%s854_s4] sm:$0xff]  ;;  %s654_s12 = scalar_lea.hbm %s653_s22, 32  ;;  %p659_p0 = scmp.lt.s32.totalorder %s653_s22, %s855_s5 }
  0x18   : > { %546 = vmatmul.msk.bf16.vlgmr.msra.gmra.mxu1 %vm252_vm0, %v585_v2  ;;  %p655_p11 = scmp.ne.s32.totalorder %s653_s22, %s654_s12  ;;  %p660_p1 = scmp.lt.s32.totalorder %s658_s15, %s654_s12 }
  0x1a   : > { %p656_p12 = pnand %p655_p11, %p772_p5  ;;  %p661_p2 = por %p660_p1, %p659_p0 }
  0x1c   : > { %p657_p13 = pneg %p656_p12 }
  0x1e   : > { %p662_p3 = pnand %p661_p2, %p657_p13 }
  0x27   : > { %541 = vmatmul.msk.bf16.gmra.mxu0 %vm252_vm0, %v586_v3 }
  0x28   : > { %547 = vmatmul.msk.bf16.gmra.mxu1 %vm252_vm0, %v586_v3 }
  0x94   : > { %v268_v4 = vpop.f32.mrf.mxu0 }
  0x95   : > { %v295_v5 = vpop.f32.mrf.mxu1  ;;  %v305_v6 = vpack.c.bf16 %v268_v4, %v268_v4 }
  0x96   : > { %v314_v7 = vpack.c.bf16 %v295_v5, %v295_v5 }
  0x97   : > { %310 = vst.msk [vmem:[#allocation2] sm:$0xf] %vm309_vm1, %v305_v6 }
  0x98   : > { %318 = vst.msk [vmem:[#allocation3] sm:$0xf] %vm309_vm1, %v314_v7 }
  0x9c   : > { %v270_v8 = vpop.f32.mrf.mxu0 }
  0x9d   : > { %v297_v9 = vpop.f32.mrf.mxu1  ;;  %v306_v10 = vpack.c.bf16 %v270_v8, %v270_v8 }
  0x9e   : > { %v315_v11 = vpack.c.bf16 %v297_v9, %v297_v9 }
  0x9f   : > { %311 = vst.msk [vmem:[#allocation2 + $0x4] sm:$0xf] %vm309_vm1, %v306_v10 }
  0xa0   : > { %319 = vst.msk [vmem:[#allocation3 + $0x4] sm:$0xf] %vm309_vm1, %v315_v11 }
  0xa4   : > { %v273_v12 = vpop.f32.mrf.mxu0 }
  0xa5   : > { %v300_v13 = vpop.f32.mrf.mxu1  ;;  %v307_v14 = vpack.c.bf16 %v273_v12, %v273_v12 }
  0xa6   : > { %v316_v15 = vpack.c.bf16 %v300_v13, %v300_v13  ;;  %v591_v16 = vld [vmem:[#allocation2] sm:$0xff] }
  0xa7   : > { %312 = vst.msk [vmem:[#allocation2 + $0x8] sm:$0xf] %vm309_vm1, %v307_v14  ;;  %v592_v17 = vld [vmem:[#allocation3] sm:$0xff]  ;;  %349 = vmatpush.bf16.msra.mxu2 %v591_v16 }
  0xa8   : > { %320 = vst.msk [vmem:[#allocation3 + $0x8] sm:$0xf] %vm309_vm1, %v316_v15  ;;  %379 = vmatpush.bf16.msra.mxu3 %v592_v17 }
  0xaa   : > { %556 = vmatmul.msk.bf16.vlgmr.msra.gmra.mxu2 %vm252_vm0, %v589_v18 }
  0xab   : > { %565 = vmatmul.msk.bf16.vlgmr.msra.gmra.mxu3 %vm252_vm0, %v590_v19 }
  0xac   : > { %v275_v20 = vpop.f32.mrf.mxu0 }
  0xad   : > { %v302_v21 = vpop.f32.mrf.mxu1  ;;  %v308_v22 = vpack.c.bf16 %v275_v20, %v275_v20 }
  0xae   : > { %v317_v23 = vpack.c.bf16 %v302_v21, %v302_v21 }
  0xaf   : > { %313 = vst.msk [vmem:[#allocation2 + $0xc] sm:$0xf] %vm309_vm1, %v308_v22 }
  0xb0   : > { %321 = vst.msk [vmem:[#allocation3 + $0xc] sm:$0xf] %vm309_vm1, %v317_v23 }
  0xb6   : > { %v593_v24 = vld [vmem:[#allocation2 + $0x8] sm:$0xff] }
  0xb7   : > { %v594_v25 = vld [vmem:[#allocation3 + $0x8] sm:$0xff]  ;;  %406 = vmatpush.bf16.msrb.mxu2 %v593_v24 }
  0xb8   : > { %429 = vmatpush.bf16.msrb.mxu3 %v594_v25 }
  0xba   : > { %570 = vmatmul.msk.bf16.vlgmr.msrb.gmra.mxu2 %vm252_vm0, %v589_v18 }
  0xbb   : > { %575 = vmatmul.msk.bf16.vlgmr.msrb.gmra.mxu3 %vm252_vm0, %v590_v19 }
 0x12d   : > { %v351_v26 = vpop.f32.mrf.mxu2 }
 0x12e   : > { %v381_v27 = vpop.f32.mrf.mxu3 }
 0x12f   : > { %v386_v28 = vsub.f32 %v351_v26, %v381_v27 }
 0x131   : > { %388 = vst.msk [vmem:[%s220_s26] sm:$0xff] %vm252_vm0, %v386_v28 }
 0x135   : > { %v353_v29 = vpop.f32.mrf.mxu2 }
 0x136   : > { %v383_v30 = vpop.f32.mrf.mxu3 }
 0x137   : > { %v387_v31 = vsub.f32 %v353_v29, %v383_v30 }
 0x139   : > { %389 = vst.msk [vmem:[%s220_s26 + $0x8] sm:$0xff] %vm252_vm0, %v387_v31 }
 0x13d   : > { %v408_v32 = vpop.f32.mrf.mxu2 }
 0x13e   : > { %v431_v33 = vpop.f32.mrf.mxu3 }
 0x13f   : > { %v436_v34 = vsub.f32 %v408_v32, %v431_v33 }
 0x141   : > { %576 = vst.msk [vmem:[%s220_s26 + $0x10] sm:$0xff] %vm252_vm0, %v436_v34 }
 0x145   : > { %v410_v35 = vpop.f32.mrf.mxu2 }
 0x146   : > { %v433_v36 = vpop.f32.mrf.mxu3 }
 0x147   : > { %v437_v37 = vsub.f32 %v410_v35, %v433_v36 }
 0x149   : > { %577 = vst.msk [vmem:[%s220_s26 + $0x18] sm:$0xff] %vm252_vm0, %v437_v37 }
 0x14a   : > { %665 = shalt.err (!%p662_p3)
}
 0x14b   : > { %s702_s23 = smov 128   ;;  %s703_s25 = smov 8  }
 0x14c   : > { %597 = dma.vmem_to_hbm [thread:$0]  (%p772_p5), %s456_s9, 512, %s458_s10, %s442_s11, %s702_s23, %s702_s23, %s703_s25  }
 0x14d PF: > { %p603_p4 = scmp.ge.s32.totalorder %s700_s21, 2  ;;  %s472_s26 = sand.u32 1, %s688_s18  }
 0x14e   : > { %s473_s30 = scalar_lea.sflag [#allocation5], %s472_s26 }
 0x14f   : > { %p600_p7 = pnand %p603_p4, %p776_p6 }
 0x151   : > { %p601_p8 = pneg %p600_p7 }
 0x153   : > { %683 = dma.done.wait (%p601_p8), %s473_s30, 512  }
 0x154   : > { %685 = vsyncadd (%p601_p8), %s473_s30, 4294966784  ;;  %p15_p9 = scmp.ge.s32.totalorder %s759_s24, 6   ;;  %s858_s18 = smov %s692_s19 }
 0x155   : > { %s859_s19 = smov %s696_s20  ;;  %s860_s20 = smov %s770_s27 }
 0x156   : > { %s861_s21 = smov %s759_s24  ;;  %17 = sbr.rel (!%p15_p9) target bundleno = 3 (0x3), region = 78 }
 0x15b   :  { %479 = vsyncpa [#allocation5], 1 }
 0x15c   :  { %481 = vsyncpa [#allocation5 + $0x1], 1 }

</bundles_post_ra>
